<compile_context>
chip_gen: v6e
topology: v6e:2x2x1
jax: 0.10.0
libtpu: 0.0.40
codegen_flags: <defaults>
</compile_context>

<pallas_src>
import jax
import jax.numpy as jnp
from jax.experimental import pallas as pl
from jax.experimental.pallas import tpu as pltpu


def _num_attn_kernel(q_ref, c_ref, o_ref):
    # q_ref: (TB, D), c_ref: (TB, L, D), o_ref: (TB, D)
    q = q_ref[...].astype(jnp.float32)           # (TB, D) f32
    c = c_ref[...]                               # native dtype (streamed tile)

    # S[b, l] = sum_d q[b, d] * c[b, l, d]  -- VPU mul + lane reduction (no MXU).
    s = jnp.sum(q[:, None, :] * c, axis=-1)      # (TB, L) f32

    # torch.nan_to_num is identity on finite values, so applying it
    # unconditionally matches the data-dependent PyTorch branch.
    s = jnp.nan_to_num(s)

    # Numerically-stable softmax over L, in f32; exact divide (TB scalars).
    s = s - jnp.max(s, axis=-1, keepdims=True)
    p = jnp.exp(s)
    p = p / jnp.sum(p, axis=-1, keepdims=True)   # (TB, L) f32

    # out[b, d] = sum_l p[b, l] * c[b, l, d]  -- VPU mul + sublane reduction.
    # Probabilities stay in f32 (no bf16 downcast before the weighted sum).
    out = jnp.sum(p[:, :, None] * c, axis=1)     # (TB, D) f32
    o_ref[...] = out.astype(o_ref.dtype)


def numerical_attention(query, context):
    """query: (B, D), context: (B, L, D) -> (B, 1, D) (matches the PyTorch module)."""
    B, D = query.shape
    Bc, L, Dc = context.shape
    assert B == Bc and D == Dc

    out_dtype = jnp.result_type(query.dtype, context.dtype)
    c_itemsize = jnp.dtype(context.dtype).itemsize

    # VMEM-padded footprint of one (L, D) context row ((8, 128) tiling).
    lpad = -(-L // 8) * 8
    dpad = -(-D // 128) * 128
    row_bytes = lpad * dpad * c_itemsize
    row_f32_bytes = lpad * dpad * 4

    # Per-chip VMEM capacity (v5e/v6e 128 MiB, v7x 64 MiB per TensorCore).
    try:
        vmem_cap = int(pltpu.get_tpu_info().vmem_capacity_bytes)
    except Exception:  # pragma: no cover - conservative fallback
        vmem_cap = 128 * 1024 * 1024
    is_v7x = vmem_cap <= (96 << 20)

    # Large streamed context tile to amortize the ~0.35us/grid-step overhead:
    # ~8 MiB per buffer on 128 MiB chips, ~5 MiB on v7x's 64 MiB.
    target_tile_bytes = int(min(8 << 20, max(2 << 20, vmem_cap // 12)))

    if B * row_bytes <= 2 * target_tile_bytes:
        TB = B                                   # whole batch in one block
    else:
        # Multiple of 8 -> sublane-dense (TB, D) query/output blocks.  B need
        # not be divisible by TB: grid = cdiv and Pallas masks the trailing
        # partial block, so there is no jnp.pad / extra HBM copy of context.
        TB = min(B, max(8, (target_tile_bytes // row_bytes) // 8 * 8))
    # TODO(synk): add an L-tiling / online-softmax path for contexts where a
    # single (L, D) row does not fit double-buffered in VMEM (very large L*D).

    n_blocks = pl.cdiv(B, TB)

    # v7x only: split a single block in two so the "parallel" batch axis can
    # be sharded across its two TensorCores.  On single-TC v5e/v6e the grid is
    # a serial loop, so splitting would only add per-step overhead.
    if is_v7x and n_blocks == 1 and B % 16 == 0 and B * row_bytes > (2 << 20):
        TB = B // 2
        n_blocks = 2

    # VMEM budget: double-buffered context tile + f32 broadcast-mul
    # intermediates + small q/p/out blocks + headroom; clamp per-generation.
    needed = (2 * TB * row_bytes + 2 * TB * row_f32_bytes
              + 6 * max(TB, 8) * dpad * 4 + (8 << 20))
    vmem_limit = int(min(max(needed, 32 << 20),
                         min(96 << 20, (vmem_cap * 3) // 4)))

    flops = 4 * B * L * D                        # two length-D / length-L dots per row
    bytes_accessed = (B * L * D * c_itemsize
                      + 2 * B * D * jnp.dtype(out_dtype).itemsize)

    out2d = pl.pallas_call(
        _num_attn_kernel,
        out_shape=jax.ShapeDtypeStruct((B, D), out_dtype),
        grid_spec=pltpu.PrefetchScalarGridSpec(
            num_scalar_prefetch=0,
            grid=(n_blocks,),
            in_specs=[
                pl.BlockSpec((TB, D), lambda i: (i, 0)),
                pl.BlockSpec((TB, L, D), lambda i: (i, 0, 0)),
            ],
            out_specs=pl.BlockSpec((TB, D), lambda i: (i, 0)),
        ),
        compiler_params=pltpu.CompilerParams(
            dimension_semantics=("parallel",),
            vmem_limit_bytes=vmem_limit,
        ),
        cost_estimate=pl.CostEstimate(
            flops=flops, transcendentals=B * L, bytes_accessed=bytes_accessed),
    )(query, context)

    return out2d.reshape(B, 1, D)


def _reference(query, context):
    # Pure-JAX reference mirroring the PyTorch forward.
    s = jnp.einsum("bd,bld->bl", query, context)[:, None, :]    # (B, 1, L)
    s = jnp.nan_to_num(s)
    attn = jax.nn.softmax(s, axis=-1)
    return jnp.einsum("bql,bld->bqd", attn, context)            # (B, 1, D)


if __name__ == "__main__":
    key = jax.random.PRNGKey(0)
    kq, kc = jax.random.split(key)

    B, L, D = 2, 8, 32
    query = jax.random.normal(kq, (B, D), dtype=jnp.float32)
    context = jax.random.normal(kc, (B, L, D), dtype=jnp.float32)

    out = jax.block_until_ready(numerical_attention(query, context))
    ref = _reference(query, context)

    assert out.shape == (B, 1, D), out.shape
    err = float(jnp.max(jnp.abs(out - ref)))
    assert jnp.allclose(out, ref, atol=1e-5, rtol=1e-5), err
    print("KERNEL_OK")
</pallas_src>

<mosaic_0001>
module attributes {stable_mosaic.version = 11 : i64} {
  func.func @_num_attn_kernel(%arg0: i32, %arg1: memref<2x32xf32, #tpu.memory_space<vmem>>, %arg2: memref<2x8x32xf32, #tpu.memory_space<vmem>>, %arg3: memref<2x32xf32, #tpu.memory_space<vmem>>) attributes {dimension_semantics = [#tpu.dimension_semantics<parallel>], iteration_bounds = array<i64: 1>, scalar_prefetch = 0 : i64, scratch_operands = 0 : i64, tpu.core_type = #tpu.core_type<tc>, window_params = [{transform_indices = @transform_0, window_bounds = array<i64: 2, 32>}, {transform_indices = @transform_1, window_bounds = array<i64: 2, 8, 32>}, {transform_indices = @transform_2, window_bounds = array<i64: 2, 32>}]} {
    %c0 = arith.constant 0 : index
    %c0_0 = arith.constant 0 : index
    %0 = vector.load %arg1[%c0, %c0_0] : memref<2x32xf32, #tpu.memory_space<vmem>>, vector<2x32xf32>
    %c0_1 = arith.constant 0 : index
    %c0_2 = arith.constant 0 : index
    %c0_3 = arith.constant 0 : index
    %1 = vector.load %arg2[%c0_1, %c0_2, %c0_3] : memref<2x8x32xf32, #tpu.memory_space<vmem>>, vector<2x8x32xf32>
    %2 = vector.shape_cast %0 : vector<2x32xf32> to vector<2x1x32xf32>
    %3 = vector.broadcast %2 : vector<2x1x32xf32> to vector<2x8x32xf32>
    %4 = arith.mulf %3, %1 : vector<2x8x32xf32>
    %cst = arith.constant dense<0.000000e+00> : vector<2x8xf32>
    %5 = vector.multi_reduction <add>, %4, %cst [2] : vector<2x8x32xf32> to vector<2x8xf32>
    %6 = arith.cmpf one, %5, %5 : vector<2x8xf32>
    %cst_4 = arith.constant 0.000000e+00 : f32
    %7 = vector.broadcast %cst_4 : f32 to vector<2x8xf32>
    %8 = arith.select %6, %7, %5 : vector<2x8xi1>, vector<2x8xf32>
    %cst_5 = arith.constant 0x7F800000 : f32
    %9 = vector.broadcast %cst_5 : f32 to vector<2x8xf32>
    %10 = arith.cmpf oeq, %8, %9 : vector<2x8xf32>
    %cst_6 = arith.constant 3.40282347E+38 : f32
    %11 = vector.broadcast %cst_6 : f32 to vector<2x8xf32>
    %12 = arith.select %10, %11, %8 : vector<2x8xi1>, vector<2x8xf32>
    %cst_7 = arith.constant 0xFF800000 : f32
    %13 = vector.broadcast %cst_7 : f32 to vector<2x8xf32>
    %14 = arith.cmpf oeq, %12, %13 : vector<2x8xf32>
    %cst_8 = arith.constant -3.40282347E+38 : f32
    %15 = vector.broadcast %cst_8 : f32 to vector<2x8xf32>
    %16 = arith.select %14, %15, %12 : vector<2x8xi1>, vector<2x8xf32>
    %cst_9 = arith.constant dense<0xFF800000> : vector<2xf32>
    %17 = vector.multi_reduction <maximumf>, %16, %cst_9 [1] : vector<2x8xf32> to vector<2xf32>
    %18 = vector.shape_cast %17 : vector<2xf32> to vector<2x1xf32>
    %19 = vector.broadcast %18 : vector<2x1xf32> to vector<2x8xf32>
    %20 = arith.subf %16, %19 : vector<2x8xf32>
    %21 = math.exp %20 : vector<2x8xf32>
    %cst_10 = arith.constant dense<0.000000e+00> : vector<2xf32>
    %22 = vector.multi_reduction <add>, %21, %cst_10 [1] : vector<2x8xf32> to vector<2xf32>
    %23 = vector.shape_cast %22 : vector<2xf32> to vector<2x1xf32>
    %24 = vector.broadcast %23 : vector<2x1xf32> to vector<2x8xf32>
    %25 = arith.divf %21, %24 : vector<2x8xf32>
    %26 = vector.shape_cast %25 : vector<2x8xf32> to vector<2x8x1xf32>
    %27 = vector.broadcast %26 : vector<2x8x1xf32> to vector<2x8x32xf32>
    %28 = arith.mulf %27, %1 : vector<2x8x32xf32>
    %cst_11 = arith.constant dense<0.000000e+00> : vector<2x32xf32>
    %29 = vector.multi_reduction <add>, %28, %cst_11 [1] : vector<2x8x32xf32> to vector<2x32xf32>
    %c0_12 = arith.constant 0 : index
    %c0_13 = arith.constant 0 : index
    %30 = vector.load %arg3[%c0_12, %c0_13] : memref<2x32xf32, #tpu.memory_space<vmem>>, vector<2x32xf32>
    tpu.vector_store %arg3[%c0_12, %c0_13], %29 {strides = array<i32>} : memref<2x32xf32, #tpu.memory_space<vmem>>, vector<2x32xf32>,
    return
  }
  func.func @transform_0(%arg0: i32) -> (i32, i32) {
    %c0_i32 = arith.constant 0 : i32
    %c0_i32_0 = arith.constant 0 : i32
    return %arg0, %c0_i32 : i32, i32
  }
  func.func @transform_1(%arg0: i32) -> (i32, i32, i32) {
    %c0_i32 = arith.constant 0 : i32
    %c0_i32_0 = arith.constant 0 : i32
    %c0_i32_1 = arith.constant 0 : i32
    return %arg0, %c0_i32, %c0_i32_0 : i32, i32, i32
  }
  func.func @transform_2(%arg0: i32) -> (i32, i32) {
    %c0_i32 = arith.constant 0 : i32
    %c0_i32_0 = arith.constant 0 : i32
    return %arg0, %c0_i32 : i32, i32
  }
}

</mosaic_0001>

<bundles_post_ra>
// kernel: tpu_custom_call.1
= control target key start
LH: loop header
LB: loop body
LE: loop exit
PB: predicated region body
PF: predicated region fallthrough
CT: control target
= control target key end

     0   :  { %7 = vsyncpa [#allocation3], 0  ;;  %s359_s0 = inlined_call_operand.hbm [shape: f32[2,32], index: 0, kind: input, shape index: {}]   ;;  %s360_s1 = inlined_call_operand.hbm [shape: f32[2,8,32], index: 1, kind: input, shape index: {}]   ;;  %s361_s2 = inlined_call_operand.hbm [shape: f32[2,32], index: 2, kind: output, shape index: {}]  }
   0x1   :  { %8 = vsyncpa [#allocation6], 0 }
   0x2   :  { %9 = vsyncpa [#allocation4], 0  ;;  %s299_s9 = smov [#allocation2]   ;;  %s300_s11 = smov [#allocation5]  }
   0x3   :  { %s16_s10 = sshll.u32 %s299_s9, 4  ;;  %s25_s12 = sshll.u32 %s300_s11, 4  ;;  %s17_s10 = int_to_ptr.vmem [resolvable:$true] %s16_s10  ;;  %s26_s12 = int_to_ptr.vmem [resolvable:$true] %s25_s12 }
   0x4   :  { %s241_s13 = scalar_lea.vmem %s17_s10, 32  ;;  %p246_p1 = scmp.lt.s32.totalorder %s17_s10, %s17_s10 }
   0x5   :  { %p242_p0 = scmp.ne.s32.totalorder %s17_s10, %s241_s13  ;;  %p247_p2 = scmp.lt.s32.totalorder %s241_s13, %s241_s13 }
   0x7   :  { %p248_p3 = por %p247_p2, %p246_p1 }
   0x9   :  { %p249_p4 = pnand %p248_p3, %p242_p0 }
   0xb   :  { %252 = shalt.err (!%p249_p4)
}
   0xc   :  { %19 = dma.hbm_to_vmem [thread:$0]  %s359_s0, 32, %s17_s10, [#allocation3]  }
   0xd   :  { %s261_s16 = scalar_lea.vmem %s26_s12, 256  ;;  %p266_p6 = scmp.lt.s32.totalorder %s26_s12, %s26_s12 }
   0xe   :  { %p262_p5 = scmp.ne.s32.totalorder %s26_s12, %s261_s16  ;;  %p267_p7 = scmp.lt.s32.totalorder %s261_s16, %s261_s16 }
  0x10   :  { %p268_p8 = por %p267_p7, %p266_p6 }
  0x12   :  { %p269_p9 = pnand %p268_p8, %p262_p5 }
  0x14   :  { %272 = shalt.err (!%p269_p9)
}
  0x15   :  { %s301_s17 = smov 128   ;;  %s302_s18 = smov 8  }
  0x16   :  { %31 = dma.hbm_to_vmem [thread:$0]  %s360_s1, 256, %s26_s12, [#allocation6], %s301_s17, %s301_s17, %s302_s18  }
  0x17   :  { %293 = dma.done.wait [#allocation3], 32  }
  0x18   :  { %294 = vsyncadd [#allocation3], 4294967264 }
  0x19   :  { %295 = dma.done.wait [#allocation6], 256  }
  0x1a   :  { %296 = vsyncadd [#allocation6], 4294967040  ;;  %v53_v0 = vlaneseq  ;;  %v303_v1 = vmov 1966171168   ;;  %v334_v12 = vld [vmem:[#allocation5] sm:$0xff]  ;;  %vm76_vm0 = vcmask 261120  }
  0x1b   :  { %v51_v2 = vunpack.c.l.s4 %v303_v1  ;;  %v215_v9 = vld.sshfl [vmem:[#allocation2] sm:$0x11 pattern:$0x75316420]  ;;  %v337_v15 = vld [vmem:[#allocation5 + $0x8] sm:$0xff]  ;;  %vm107_vm7 = vcmask 1041409  }
  0x1c   :  { %v327_v3 = vshrl.u32 %v53_v0, 7  ;;  %v98_v4 = vand.u32 127, %v53_v0  ;;  %v49_v11 = vcombine.high %v215_v9, %v215_v9  ;;  %vm110_vm8 = vcmask 58368   ;;  %s305_s0 = smov [#allocation7]  }
  0x1d   :  { %v52_v5 = vunpack.c.0.s8 %v51_v2  ;;  %v304_v33 = vmov 0   ;;  %s205_s1 = sshll.u32 %s305_s0, 4  ;;  %vm197_vm9 = vcmask 254976   ;;  %s206_s1 = int_to_ptr.vmem [resolvable:$true] %s205_s1 }
  0x1e   :  { %v101_v6 = vsub.s32 %v98_v4, %v327_v3  ;;  %v332_v8 = vsub.s32 0, %v327_v3  ;;  %224 = vset.pattern.permute.xlu0 %v304_v33  ;;  %223 = vset.pattern.permute.xlu1 %v304_v33  ;;  %v121_v34 = vsub.s32 1, %v327_v3  ;;  %s273_s21 = scalar_lea.vmem %s206_s1, 32  ;;  %p278_p11 = scmp.lt.s32.totalorder %s206_s1, %s206_s1 }
  0x1f   :  { %v55_v7 = vsub.s32 %v52_v5, %v327_v3  ;;  %p274_p10 = scmp.ne.s32.totalorder %s206_s1, %s273_s21  ;;  %p279_p12 = scmp.lt.s32.totalorder %s273_s21, %s273_s21 }
  0x21   :  { %v56_v10 = vrot.slane %v215_v9, %v55_v7  ;;  %v63_v14 = vrot.slane %v49_v11, %v55_v7  ;;  %p280_p13 = por %p279_p12, %p278_p11 }
  0x23   :  { %v67_v13 = vrot.slane %v56_v10, %v332_v8  ;;  %v71_v17 = vrot.slane %v63_v14, %v332_v8  ;;  %p281_p0 = pnand %p280_p13, %p274_p10 }
  0x25   :  { %v74_v16 = vmul.f32 %v67_v13, %v334_v12  ;;  %v75_v19 = vmul.f32 %v71_v17, %v337_v15 }
  0x27   :  { %v77_v18 = vsel %vm76_vm0, %v74_v16, 0.0  ;;  %v80_v20 = vsel %vm76_vm0, %v75_v19, 0.0 }
  0x28   :  { %78 = vadd.xlane.f32.xlu0 %v77_v18 }
  0x2c   :  { %81 = vadd.xlane.f32.xlu0 %v80_v20 }
  0xb1   :  { %v79_v21 = vpop.xlane.xlu0 %78 }
  0xb2   :  { %vm83_vm1 = vcmp.ne.f32.partialorder %v79_v21, %v79_v21 }
  0xb3   :  { %v85_v22 = vsel %vm83_vm1, 0.0, %v79_v21 }
  0xb4   :  { %vm87_vm2 = vcmp.eq.f32.partialorder %v85_v22, inf }
  0xb5   :  { %v89_v23 = vsel %vm87_vm2, 3.4028235e+38, %v85_v22  ;;  %v82_v24 = vpop.xlane.xlu0 %81 }
  0xb6   :  { %vm91_vm3 = vcmp.eq.f32.partialorder %v89_v23, -inf  ;;  %vm84_vm4 = vcmp.ne.f32.partialorder %v82_v24, %v82_v24 }
  0xb7   :  { %v86_v25 = vsel %vm84_vm4, 0.0, %v82_v24  ;;  %v93_v26 = vsel %vm91_vm3, -3.4028235e+38, %v89_v23 }
  0xb8   :  { %vm88_vm5 = vcmp.eq.f32.partialorder %v86_v25, inf  ;;  %v102_v29 = vrot.slane %v93_v26, %v101_v6 }
  0xb9   :  { %v90_v27 = vsel %vm88_vm5, 3.4028235e+38, %v86_v25 }
  0xba   :  { %vm92_vm6 = vcmp.eq.f32.partialorder %v90_v27, -inf }
  0xbb   :  { %v94_v28 = vsel %vm92_vm6, -3.4028235e+38, %v90_v27 }
  0xbc   :  { %v106_v30 = vrot.slane %v94_v28, %v101_v6 }
  0xbe   :  { %v108_v31 = vsel %vm107_vm7, %v106_v30, %v102_v29 }
  0xbf   :  { %v111_v32 = vsel %vm110_vm8, %v108_v31, -inf }
  0xc0   :  { %112 = vmax.xlane.f32.xlu1 %v111_v32 }
 0x149   :  { %v113_v35 = vpop.xlane.xlu1 %112 }
 0x14a   :  { %v118_v36 = vrot.slane %v113_v35, %v332_v8  ;;  %v122_v37 = vrot.slane %v113_v35, %v121_v34 }
 0x14c   :  { %v125_v38 = vsub.f32 %v93_v26, %v118_v36  ;;  %v126_v39 = vsub.f32 %v94_v28, %v122_v37 }
 0x14e   :  { %v127_v40 = vmul.f32 1.442695, %v125_v38  ;;  %v129_v41 = vmul.f32 1.442695, %v126_v39 }
 0x150   :  { %225 = vpow2.f32 %v127_v40 }
 0x151   :  { %227 = vpow2.f32 %v129_v41 }
 0x15d   :  { %v226_v42 = vpop.eup %225 }
 0x15e   :  { %v228_v43 = vpop.eup %227  ;;  %134 = vperm.xlu1 %223, %v226_v42  }
 0x15f   :  { %137 = vperm.xlu0 %224, %v228_v43  }
 0x1d9   :  { %v135_v44 = vpop.permute.xlu1 %134 }
 0x1da   :  { %v138_v45 = vpop.permute.xlu0 %137  ;;  %v142_v46 = vrot.slane %v135_v44, %v101_v6 }
 0x1db   :  { %v146_v47 = vrot.slane %v138_v45, %v101_v6 }
 0x1dd   :  { %v147_v48 = vsel %vm107_vm7, %v146_v47, %v142_v46 }
 0x1de   :  { %v149_v49 = vsel %vm110_vm8, %v147_v48, 0.0 }
 0x1df   :  { %150 = vadd.xlane.f32.xlu1 %v149_v49 }
 0x268   :  { %v151_v50 = vpop.xlane.xlu1 %150 }
 0x269   :  { %v156_v51 = vrot.slane %v151_v50, %v332_v8  ;;  %v160_v52 = vrot.slane %v151_v50, %v121_v34 }
 0x26b   :  { %229 = vrcp.f32 %v156_v51 }
 0x26c   :  { %231 = vrcp.f32 %v160_v52 }
 0x278   :  { %v230_v53 = vpop.eup %229 }
 0x279   :  { %v164_v54 = vmul.f32 %v230_v53, %v226_v42  ;;  %v232_v55 = vpop.eup %231 }
 0x27a   :  { %v166_v56 = vmul.f32 %v232_v55, %v228_v43 }
 0x27b   :  { %169 = vperm.xlu0 %224, %v164_v54  }
 0x27f   :  { %174 = vperm.xlu0 %224, %v166_v56  }
 0x2f6   :  { %v170_v57 = vpop.permute.xlu0 %169 }
 0x2f7   :  { %v177_v58 = vmul.f32 %v170_v57, %v334_v12 }
 0x2f9   :  { %v179_v59 = vsel %vm76_vm0, %v177_v58, 0.0 }
 0x2fa   :  { %v180_v60 = vrot.slane %v179_v59, 4  ;;  %v175_v61 = vpop.permute.xlu0 %174 }
 0x2fb   :  { %v178_v62 = vmul.f32 %v175_v61, %v337_v15 }
 0x2fc   :  { %v181_v63 = vadd.f32 %v180_v60, %v179_v59 }
 0x2fd   :  { %v186_v0 = vsel %vm76_vm0, %v178_v62, 0.0 }
 0x2fe   :  { %v182_v1 = vrot.slane %v181_v63, 2  ;;  %v187_v2 = vrot.slane %v186_v0, 4 }
 0x300   :  { %v183_v3 = vadd.f32 %v182_v1, %v181_v63  ;;  %v188_v4 = vadd.f32 %v187_v2, %v186_v0 }
 0x302   :  { %v189_v5 = vrot.slane %v188_v4, 2  ;;  %v184_v6 = vrot.slane %v183_v3, 1 }
 0x304   :  { %v190_v7 = vadd.f32 %v189_v5, %v188_v4  ;;  %v185_v9 = vadd.f32 %v184_v6, %v183_v3 }
 0x306   :  { %v191_v8 = vrot.slane %v190_v7, 1 }
 0x308   :  { %v192_v10 = vadd.f32 %v191_v8, %v190_v7 }
 0x30a   :  { %v195_v11 = vsel %vm107_vm7, %v192_v10, %v185_v9 }
 0x30b   :  { %198 = vst.msk [vmem:[#allocation7] sm:$0x3] %vm197_vm9, %v195_v11 }
 0x30c   :  { %284 = shalt.err (!%p281_p0)
}
 0x30d   :  { %208 = dma.vmem_to_hbm [thread:$0]  %s206_s1, 32, %s361_s2, [#allocation4]  }
 0x30e   :  { %297 = dma.done.wait [#allocation4], 32  }
 0x30f   :  { %298 = vsyncadd [#allocation4], 4294967264 }
 0x310   :  { %212 = vsyncpa [#allocation3], 1 }
 0x311   :  { %213 = vsyncpa [#allocation6], 1 }
 0x312   :  { %214 = vsyncpa [#allocation4], 1 }

</bundles_post_ra>
